<compile_context>
chip_gen: v6e
topology: v6e:2x2x1
jax: 0.10.0
libtpu: 0.0.40
codegen_flags: <defaults>
</compile_context>

<pallas_src>
import functools

import jax
import jax.numpy as jnp
from jax import lax
from jax.experimental import pallas as pl
from jax.experimental.pallas import tpu as pltpu

_NEG_INF = -1e30  # finite "minus infinity": avoids inf-inf NaNs in the online softmax


def _round_up(x, m):
    return ((x + m - 1) // m) * m


def _cdiv(a, b):
    return (a + b - 1) // b


# --------------------------------------------------------------------------- #
# Kernel
# --------------------------------------------------------------------------- #
def _attention_kernel(x_ref, ctx_ref, w1_ref, w2_ref, o_ref,
                      m_ref, l_ref, acc_ref, *, t_valid):
    # x_ref:   (Bt, D)       input dtype
    # ctx_ref: (Bt, Tt, D)   input dtype (one T tile of the context)
    # w1_ref:  (D, D)        W[:, :D].T  -> applied to x               (VMEM-resident)
    # w2_ref:  (D, D)        W[:, D:].T  -> applied to weighted context (VMEM-resident)
    # o_ref:   (Bt, D)
    # m_ref, l_ref: (Bt, 1) f32  running softmax max / denominator
    # acc_ref: (Bt, D) f32       running un-normalized weighted context
    t = pl.program_id(1)

    @pl.when(t == 0)
    def _init():
        m_ref[...] = jnp.full(m_ref.shape, _NEG_INF, m_ref.dtype)
        l_ref[...] = jnp.zeros(l_ref.shape, l_ref.dtype)
        acc_ref[...] = jnp.zeros(acc_ref.shape, acc_ref.dtype)

    x = x_ref[...]                                    # (Bt, D)
    xf = x.astype(jnp.float32)
    cf = ctx_ref[...].astype(jnp.float32)             # (Bt, Tt, D)

    # --- scores on the VPU/XLU: a q=1 batched matmul would use <1% of the MXU
    #     rows and re-push ctx as MXU weights; the HBM-bound roofline makes the
    #     VPU flops free filler.
    scores = jnp.sum(cf * xf[:, None, :], axis=-1)    # (Bt, Tt) f32

    if t_valid is not None:                           # mask wrapper-added T padding
        bb, bt = scores.shape
        pos = t * bt + lax.broadcasted_iota(jnp.int32, (bb, bt), 1)
        scores = jnp.where(pos < t_valid, scores, _NEG_INF)

    # --- flash-style online softmax across T tiles; all state 2-D and f32 ---
    m_prev = m_ref[...]                                             # (Bt, 1)
    m_new = jnp.maximum(m_prev, jnp.max(scores, axis=-1, keepdims=True))
    alpha = jnp.exp(m_prev - m_new)                                 # (Bt, 1)
    p = jnp.exp(scores - m_new)                                     # (Bt, Tt)
    l_ref[...] = alpha * l_ref[...] + jnp.sum(p, axis=-1, keepdims=True)
    # weighted-context partial: sum_t p[b,t] * ctx[b,t,:]  (VPU mul + sublane reduce)
    acc_ref[...] = alpha * acc_ref[...] + jnp.sum(p[:, :, None] * cf, axis=1)
    m_ref[...] = m_new

    # --- finalize on the last T tile: exact normalization + fused linear + tanh ---
    @pl.when(t == pl.num_programs(1) - 1)
    def _finalize():
        wc = acc_ref[...] / l_ref[...]                              # (Bt, D) f32, exact
        w_dt = w1_ref.dtype
        o = jnp.dot(x.astype(w_dt), w1_ref[...],
                    preferred_element_type=jnp.float32)
        o = o + jnp.dot(wc.astype(w_dt), w2_ref[...],
                        preferred_element_type=jnp.float32)
        o_ref[...] = jnp.tanh(o).astype(o_ref.dtype)


# --------------------------------------------------------------------------- #
# Tiling / VMEM heuristics
# --------------------------------------------------------------------------- #
def _vmem_limit_bytes():
    """~87.5% of physical VMEM (headroom for compiler scratch), capped at 112 MiB.
    Falls back to the smallest generation (v7x: 64 MiB / TensorCore)."""
    cap = 64 * 1024 * 1024
    try:
        cap = int(getattr(pltpu.get_tpu_info(), "vmem_capacity_bytes", cap)) or cap
    except Exception:
        pass
    return max(32 * 1024 * 1024, min(cap * 7 // 8, 112 * 1024 * 1024))


def _pick_tiles(B, T, D_pad, itemsize, vmem_limit, block_b=None, block_t=None):
    """Pick (block_b, block_t): grow the batch tile first (MXU rows for the final
    linear, dense stores), then give the remaining VMEM to the T tile."""
    if block_b is not None and block_t is not None:
        return block_b, block_t

    b8 = _round_up(B, 8)
    t8 = _round_up(T, 8)

    # Conservative VMEM cost per context element: double-buffered DMA tile plus
    # in-kernel f32 temporaries (upcast + p*ctx product).
    ctx_elem = 2 * itemsize + 8
    reserve = 2 * (2 * D_pad * D_pad * itemsize) + (4 << 20)  # weight halves (dbl-buf) + slack
    budget = max(vmem_limit - reserve, 4 << 20)

    def fits(bb, bt):
        return bb * bt * D_pad * ctx_elem + bb * D_pad * (4 * itemsize + 8) <= budget

    bb_cap = min(b8, 1024)
    if b8 >= 16:
        # keep >=2 batch blocks so megacore / v7x's two TensorCores both get work
        bb_cap = min(bb_cap, max(8, (b8 // 2) // 8 * 8))
    bt_cap = min(t8, 2048)

    bb = 8 if block_b is None else block_b
    bt = 8 if block_t is None else block_t
    if block_b is None:
        while bb * 2 <= min(bb_cap, 256) and fits(bb * 2, bt):
            bb *= 2
    if block_t is None:
        while bt * 2 <= bt_cap and fits(bb, bt * 2):
            bt *= 2
    if block_b is None:
        while bb * 2 <= bb_cap and fits(bb * 2, bt):
            bb *= 2
        bb = _round_up(_cdiv(b8, _cdiv(b8, bb)), 8)   # shave padding waste
    if block_t is None:
        bt = _round_up(_cdiv(t8, _cdiv(t8, bt)), 8)
    return bb, bt


def _pad_to(a, shape):
    pads = [(0, s - d) for d, s in zip(a.shape, shape)]
    if not any(hi for _, hi in pads):
        return a
    return jnp.pad(a, pads)


# --------------------------------------------------------------------------- #
# Wrapper
# --------------------------------------------------------------------------- #
def attention_forward(x, context, weight, *, block_b=None, block_t=None):
    """x: (B, D); context: (B, T, D) or None; weight: (D, 2D) (torch Linear layout)."""
    if context is None:
        return x
    B, D = x.shape
    Bc, T, Dc = context.shape
    assert Bc == B and Dc == D
    assert weight.shape == (D, 2 * D)

    itemsize = jnp.dtype(context.dtype).itemsize
    D_pad = _round_up(D, 128)                  # lane-dense loads/stores (v5e: single vst slot)
    vmem_limit = _vmem_limit_bytes()
    bb, bt = _pick_tiles(B, T, D_pad, itemsize, vmem_limit,
                         block_b=block_b, block_t=block_t)
    B_pad = _round_up(B, bb)
    T_pad = _round_up(T, bt)

    # Split W.T into its x / weighted-context halves so the kernel never
    # concatenates along the lane axis (two accumulated matmuls instead).
    # TODO(synk): in a real model pre-split/pre-transpose (and pad) the weight at
    # init time; under jit with constant weights this folds away anyway.
    w1_t = _pad_to(jnp.transpose(weight[:, :D]), (D_pad, D_pad))
    w2_t = _pad_to(jnp.transpose(weight[:, D:]), (D_pad, D_pad))

    x_p = _pad_to(x, (B_pad, D_pad))
    ctx_p = _pad_to(context, (B_pad, T_pad, D_pad))

    grid = (B_pad // bb, T_pad // bt)
    kernel = functools.partial(_attention_kernel,
                               t_valid=None if T_pad == T else T)

    out = pl.pallas_call(
        kernel,
        out_shape=jax.ShapeDtypeStruct((B_pad, D_pad), x.dtype),
        grid_spec=pltpu.PrefetchScalarGridSpec(
            num_scalar_prefetch=0,
            grid=grid,
            in_specs=[
                pl.BlockSpec((bb, D_pad), lambda b, t: (b, 0)),
                pl.BlockSpec((bb, bt, D_pad), lambda b, t: (b, t, 0)),
                # Constant index maps: the weight halves are DMA'd once and stay
                # VMEM-resident across the whole grid.
                pl.BlockSpec((D_pad, D_pad), lambda b, t: (0, 0)),
                pl.BlockSpec((D_pad, D_pad), lambda b, t: (0, 0)),
            ],
            out_specs=pl.BlockSpec((bb, D_pad), lambda b, t: (b, 0)),
            scratch_shapes=[
                pltpu.VMEM((bb, 1), jnp.float32),      # running max  m
                pltpu.VMEM((bb, 1), jnp.float32),      # running sum  l
                pltpu.VMEM((bb, D_pad), jnp.float32),  # weighted-context accumulator
            ],
        ),
        compiler_params=pltpu.CompilerParams(
            dimension_semantics=("parallel", "arbitrary"),
            vmem_limit_bytes=vmem_limit,
        ),
    )(x_p, ctx_p, w1_t, w2_t)

    if B_pad != B or D_pad != D:
        out = out[:B, :D]
    return out


# --------------------------------------------------------------------------- #
# Reference + self-test
# --------------------------------------------------------------------------- #
def _reference(x, context, weight):
    # Pure-JAX reference mirroring the PyTorch forward. HIGHEST precision so the
    # comparison is not dominated by XLA's default reduced-precision f32 matmuls.
    hp = lax.Precision.HIGHEST
    scores = jnp.einsum("btd,bd->bt", context, x, precision=hp)
    attn = jax.nn.softmax(scores, axis=1)
    wc = jnp.einsum("bt,btd->bd", attn, context, precision=hp)
    o = jnp.dot(jnp.concatenate([x, wc], axis=1), weight.T, precision=hp)
    return jnp.tanh(o)


def _make_inputs(key, B, T, D, dtype=jnp.float32):
    kx, kc, kw = jax.random.split(key, 3)
    # Modest activation scale keeps the (unscaled, Luong-style) dot-product scores
    # O(1), so the check is not hypersensitive to MXU rounding of the final linear.
    x = 0.3 * jax.random.normal(kx, (B, D), dtype)
    ctx = 0.3 * jax.random.normal(kc, (B, T, D), dtype)
    bound = 1.0 / (2.0 * D) ** 0.5       # nn.Linear(dim*2, dim, bias=False) init range
    w = jax.random.uniform(kw, (D, 2 * D), dtype, minval=-bound, maxval=bound)
    return x, ctx, w


def _check(name, out, ref):
    assert out.shape == ref.shape, name
    # Tolerance covers MXU default-precision f32 matmuls in the kernel's final
    # linear vs. the exact-f32 reference; exact-precision runs agree to ~1e-6.
    assert jnp.allclose(out, ref, atol=5e-3, rtol=5e-3), f"mismatch vs reference: {name}"


if __name__ == "__main__":
    k1, k2, k3 = jax.random.split(jax.random.PRNGKey(0), 3)

    # Case 1: aligned shapes; batch grid of 2 blocks (megacore path), single T tile.
    x, ctx, w = _make_inputs(k1, 16, 16, 128)
    out = jax.block_until_ready(attention_forward(x, ctx, w))
    _check("aligned", out, _reference(x, ctx, w))

    # Case 2: force the T-tiled online-softmax path (3 T tiles + tail masking).
    x, ctx, w = _make_inputs(k2, 16, 20, 128)
    out = jax.block_until_ready(attention_forward(x, ctx, w, block_b=8, block_t=8))
    _check("online-softmax", out, _reference(x, ctx, w))

    # Case 3: unaligned B/T/D exercise the wrapper's padding + masking path.
    x, ctx, w = _make_inputs(k3, 6, 10, 96)
    out = jax.block_until_ready(attention_forward(x, ctx, w))
    _check("padded", out, _reference(x, ctx, w))

    # context=None path: identity.
    assert jnp.array_equal(attention_forward(x, None, w), x)

    print("KERNEL_OK")
</pallas_src>

<mosaic_0001>
module attributes {stable_mosaic.version = 11 : i64} {
  func.func @_attention_kernel(%arg0: i32, %arg1: i32, %arg2: memref<8x128xf32, #tpu.memory_space<vmem>>, %arg3: memref<8x16x128xf32, #tpu.memory_space<vmem>>, %arg4: memref<128x128xf32, #tpu.memory_space<vmem>>, %arg5: memref<128x128xf32, #tpu.memory_space<vmem>>, %arg6: memref<8x128xf32, #tpu.memory_space<vmem>>, %arg7: memref<8x1xf32, #tpu.memory_space<vmem>>, %arg8: memref<8x1xf32, #tpu.memory_space<vmem>>, %arg9: memref<8x128xf32, #tpu.memory_space<vmem>>) attributes {dimension_semantics = [#tpu.dimension_semantics<parallel>, #tpu.dimension_semantics<arbitrary>], iteration_bounds = array<i64: 2, 1>, scalar_prefetch = 0 : i64, scratch_operands = 3 : i64, tpu.core_type = #tpu.core_type<tc>, window_params = [{transform_indices = @transform_0, window_bounds = array<i64: 8, 128>}, {transform_indices = @transform_1, window_bounds = array<i64: 8, 16, 128>}, {pipeline_mode = #tpu.pipeline_mode<synchronous>, transform_indices = @transform_2, window_bounds = array<i64: 128, 128>}, {pipeline_mode = #tpu.pipeline_mode<synchronous>, transform_indices = @transform_3, window_bounds = array<i64: 128, 128>}, {transform_indices = @transform_4, window_bounds = array<i64: 8, 128>}]} {
    %c0_i32 = arith.constant 0 : i32
    %0 = arith.cmpi eq, %arg1, %c0_i32 : i32
    %1 = arith.extui %0 : i1 to i32
    %c0_i32_0 = arith.constant 0 : i32
    %2 = arith.cmpi ne, %1, %c0_i32_0 : i32
    scf.if %2 {
      %cst_22 = arith.constant -1.000000e+30 : f32
      %37 = vector.broadcast %cst_22 : f32 to vector<8x1xf32>
      %c0_23 = arith.constant 0 : index
      %c0_24 = arith.constant 0 : index
      %38 = vector.load %arg7[%c0_23, %c0_24] : memref<8x1xf32, #tpu.memory_space<vmem>>, vector<8x1xf32>
      tpu.vector_store %arg7[%c0_23, %c0_24], %37 {strides = array<i32>} : memref<8x1xf32, #tpu.memory_space<vmem>>, vector<8x1xf32>,
      %cst_25 = arith.constant 0.000000e+00 : f32
      %39 = vector.broadcast %cst_25 : f32 to vector<8x1xf32>
      %c0_26 = arith.constant 0 : index
      %c0_27 = arith.constant 0 : index
      %40 = vector.load %arg8[%c0_26, %c0_27] : memref<8x1xf32, #tpu.memory_space<vmem>>, vector<8x1xf32>
      tpu.vector_store %arg8[%c0_26, %c0_27], %39 {strides = array<i32>} : memref<8x1xf32, #tpu.memory_space<vmem>>, vector<8x1xf32>,
      %cst_28 = arith.constant 0.000000e+00 : f32
      %41 = vector.broadcast %cst_28 : f32 to vector<8x128xf32>
      %c0_29 = arith.constant 0 : index
      %c0_30 = arith.constant 0 : index
      %42 = vector.load %arg9[%c0_29, %c0_30] : memref<8x128xf32, #tpu.memory_space<vmem>>, vector<8x128xf32>
      tpu.vector_store %arg9[%c0_29, %c0_30], %41 {strides = array<i32>} : memref<8x128xf32, #tpu.memory_space<vmem>>, vector<8x128xf32>,
    } else {
    }
    %c0 = arith.constant 0 : index
    %c0_1 = arith.constant 0 : index
    %3 = vector.load %arg2[%c0, %c0_1] : memref<8x128xf32, #tpu.memory_space<vmem>>, vector<8x128xf32>
    %c0_2 = arith.constant 0 : index
    %c0_3 = arith.constant 0 : index
    %c0_4 = arith.constant 0 : index
    %4 = vector.load %arg3[%c0_2, %c0_3, %c0_4] : memref<8x16x128xf32, #tpu.memory_space<vmem>>, vector<8x16x128xf32>
    %5 = vector.shape_cast %3 : vector<8x128xf32> to vector<8x1x128xf32>
    %6 = vector.broadcast %5 : vector<8x1x128xf32> to vector<8x16x128xf32>
    %7 = arith.mulf %4, %6 : vector<8x16x128xf32>
    %cst = arith.constant dense<0.000000e+00> : vector<8x16xf32>
    %8 = vector.multi_reduction <add>, %7, %cst [2] : vector<8x16x128xf32> to vector<8x16xf32>
    %c0_5 = arith.constant 0 : index
    %c0_6 = arith.constant 0 : index
    %9 = vector.load %arg7[%c0_5, %c0_6] : memref<8x1xf32, #tpu.memory_space<vmem>>, vector<8x1xf32>
    %cst_7 = arith.constant dense<0xFF800000> : vector<8xf32>
    %10 = vector.multi_reduction <maximumf>, %8, %cst_7 [1] : vector<8x16xf32> to vector<8xf32>
    %11 = vector.shape_cast %10 : vector<8xf32> to vector<8x1xf32>
    %12 = arith.maximumf %9, %11 : vector<8x1xf32>
    %13 = arith.subf %9, %12 : vector<8x1xf32>
    %14 = math.exp %13 : vector<8x1xf32>
    %15 = vector.broadcast %12 : vector<8x1xf32> to vector<8x16xf32>
    %16 = arith.subf %8, %15 : vector<8x16xf32>
    %17 = math.exp %16 : vector<8x16xf32>
    %c0_8 = arith.constant 0 : index
    %c0_9 = arith.constant 0 : index
    %18 = vector.load %arg8[%c0_8, %c0_9] : memref<8x1xf32, #tpu.memory_space<vmem>>, vector<8x1xf32>
    %19 = arith.mulf %14, %18 : vector<8x1xf32>
    %cst_10 = arith.constant dense<0.000000e+00> : vector<8xf32>
    %20 = vector.multi_reduction <add>, %17, %cst_10 [1] : vector<8x16xf32> to vector<8xf32>
    %21 = vector.shape_cast %20 : vector<8xf32> to vector<8x1xf32>
    %22 = arith.addf %19, %21 : vector<8x1xf32>
    %c0_11 = arith.constant 0 : index
    %c0_12 = arith.constant 0 : index
    %23 = vector.load %arg8[%c0_11, %c0_12] : memref<8x1xf32, #tpu.memory_space<vmem>>, vector<8x1xf32>
    tpu.vector_store %arg8[%c0_11, %c0_12], %22 {strides = array<i32>} : memref<8x1xf32, #tpu.memory_space<vmem>>, vector<8x1xf32>,
    %c0_13 = arith.constant 0 : index
    %c0_14 = arith.constant 0 : index
    %24 = vector.load %arg9[%c0_13, %c0_14] : memref<8x128xf32, #tpu.memory_space<vmem>>, vector<8x128xf32>
    %25 = vector.broadcast %14 : vector<8x1xf32> to vector<8x128xf32>
    %26 = arith.mulf %25, %24 : vector<8x128xf32>
    %27 = vector.shape_cast %17 : vector<8x16xf32> to vector<8x16x1xf32>
    %28 = vector.broadcast %27 : vector<8x16x1xf32> to vector<8x16x128xf32>
    %29 = arith.mulf %28, %4 : vector<8x16x128xf32>
    %cst_15 = arith.constant dense<0.000000e+00> : vector<8x128xf32>
    %30 = vector.multi_reduction <add>, %29, %cst_15 [1] : vector<8x16x128xf32> to vector<8x128xf32>
    %31 = arith.addf %26, %30 : vector<8x128xf32>
    %c0_16 = arith.constant 0 : index
    %c0_17 = arith.constant 0 : index
    %32 = vector.load %arg9[%c0_16, %c0_17] : memref<8x128xf32, #tpu.memory_space<vmem>>, vector<8x128xf32>
    tpu.vector_store %arg9[%c0_16, %c0_17], %31 {strides = array<i32>} : memref<8x128xf32, #tpu.memory_space<vmem>>, vector<8x128xf32>,
    %c0_18 = arith.constant 0 : index
    %c0_19 = arith.constant 0 : index
    %33 = vector.load %arg7[%c0_18, %c0_19] : memref<8x1xf32, #tpu.memory_space<vmem>>, vector<8x1xf32>
    tpu.vector_store %arg7[%c0_18, %c0_19], %12 {strides = array<i32>} : memref<8x1xf32, #tpu.memory_space<vmem>>, vector<8x1xf32>,
    %c0_i32_20 = arith.constant 0 : i32
    %34 = arith.cmpi eq, %arg1, %c0_i32_20 : i32
    %35 = arith.extui %34 : i1 to i32
    %c0_i32_21 = arith.constant 0 : i32
    %36 = arith.cmpi ne, %35, %c0_i32_21 : i32
    scf.if %36 {
      %c0_22 = arith.constant 0 : index
      %c0_23 = arith.constant 0 : index
      %37 = vector.load %arg9[%c0_22, %c0_23] : memref<8x128xf32, #tpu.memory_space<vmem>>, vector<8x128xf32>
      %c0_24 = arith.constant 0 : index
      %c0_25 = arith.constant 0 : index
      %38 = vector.load %arg8[%c0_24, %c0_25] : memref<8x1xf32, #tpu.memory_space<vmem>>, vector<8x1xf32>
      %39 = vector.broadcast %38 : vector<8x1xf32> to vector<8x128xf32>
      %40 = arith.divf %37, %39 : vector<8x128xf32>
      %c0_26 = arith.constant 0 : index
      %c0_27 = arith.constant 0 : index
      %41 = vector.load %arg4[%c0_26, %c0_27] : memref<128x128xf32, #tpu.memory_space<vmem>>, vector<128x128xf32>
      %cst_28 = arith.constant dense<0.000000e+00> : vector<8x128xf32>
      %42 = tpu.matmul %3, %41, %cst_28 {dimension_numbers = #tpu.dot_dimension_numbers<[1], [0], [0], [1], [0, 0, 1, 1], [], []>} : vector<8x128xf32>, vector<128x128xf32>, vector<8x128xf32> -> vector<8x128xf32>
      %c0_29 = arith.constant 0 : index
      %c0_30 = arith.constant 0 : index
      %43 = vector.load %arg5[%c0_29, %c0_30] : memref<128x128xf32, #tpu.memory_space<vmem>>, vector<128x128xf32>
      %cst_31 = arith.constant dense<0.000000e+00> : vector<8x128xf32>
      %44 = tpu.matmul %40, %43, %cst_31 {dimension_numbers = #tpu.dot_dimension_numbers<[1], [0], [0], [1], [0, 0, 1, 1], [], []>} : vector<8x128xf32>, vector<128x128xf32>, vector<8x128xf32> -> vector<8x128xf32>
      %45 = arith.addf %42, %44 : vector<8x128xf32>
      %46 = math.tanh %45 : vector<8x128xf32>
      %c0_32 = arith.constant 0 : index
      %c0_33 = arith.constant 0 : index
      %47 = vector.load %arg6[%c0_32, %c0_33] : memref<8x128xf32, #tpu.memory_space<vmem>>, vector<8x128xf32>
      tpu.vector_store %arg6[%c0_32, %c0_33], %46 {strides = array<i32>} : memref<8x128xf32, #tpu.memory_space<vmem>>, vector<8x128xf32>,
    } else {
    }
    return
  }
  func.func @transform_0(%arg0: i32, %arg1: i32) -> (i32, i32) {
    %c0_i32 = arith.constant 0 : i32
    %c0_i32_0 = arith.constant 0 : i32
    return %arg0, %c0_i32 : i32, i32
  }
  func.func @transform_1(%arg0: i32, %arg1: i32) -> (i32, i32, i32) {
    %c0_i32 = arith.constant 0 : i32
    %c0_i32_0 = arith.constant 0 : i32
    return %arg0, %arg1, %c0_i32 : i32, i32, i32
  }
  func.func @transform_2(%arg0: i32, %arg1: i32) -> (i32, i32) {
    %c0_i32 = arith.constant 0 : i32
    %c0_i32_0 = arith.constant 0 : i32
    %c0_i32_1 = arith.constant 0 : i32
    return %c0_i32, %c0_i32_0 : i32, i32
  }
  func.func @transform_3(%arg0: i32, %arg1: i32) -> (i32, i32) {
    %c0_i32 = arith.constant 0 : i32
    %c0_i32_0 = arith.constant 0 : i32
    %c0_i32_1 = arith.constant 0 : i32
    return %c0_i32, %c0_i32_0 : i32, i32
  }
  func.func @transform_4(%arg0: i32, %arg1: i32) -> (i32, i32) {
    %c0_i32 = arith.constant 0 : i32
    %c0_i32_0 = arith.constant 0 : i32
    return %arg0, %c0_i32 : i32, i32
  }
}

</mosaic_0001>

<bundles_post_ra>
// kernel: tpu_custom_call.1
= control target key start
LH: loop header
LB: loop body
LE: loop exit
PB: predicated region body
PF: predicated region fallthrough
CT: control target
= control target key end

     0   :  { %s2295_s0 = inlined_call_operand.hbm [shape: f32[16,128], index: 0, kind: input, shape index: {}]   ;;  %s2296_s1 = inlined_call_operand.hbm [shape: f32[16,16,128], index: 1, kind: input, shape index: {}]   ;;  %s2297_s2 = inlined_call_operand.hbm [shape: f32[128,128], index: 2, kind: input, shape index: {}]   ;;  %s2298_s3 = inlined_call_operand.hbm [shape: f32[128,128], index: 3, kind: input, shape index: {}]   ;;  %s2299_s4 = inlined_call_operand.hbm [shape: f32[16,128], index: 4, kind: output, shape index: {}]  }
   0x1   :  { %2302 = sst [smem:[#allocation19_spill]] %s2295_s0 }
   0x2   :  { %2303 = sst [smem:[#allocation20_spill]] %s2297_s2 }
   0x3   :  { %2304 = sst [smem:[#allocation21_spill]] %s2298_s3 }
   0x4   :  { %9 = vsyncpa [#allocation6], 0 }
   0x5   :  { %11 = vsyncpa [#allocation6 + $0x1], 0 }
   0x6   :  { %12 = vsyncpa [#allocation9], 0 }
   0x7   :  { %14 = vsyncpa [#allocation9 + $0x1], 0 }
   0x8   :  { %15 = vsyncpa [#allocation12], 0 }
   0x9   :  { %16 = vsyncpa [#allocation7], 0 }
   0xa   :  { %18 = vsyncpa [#allocation7 + $0x1], 0  ;;  %s1764_s15 = smov 0   ;;  %s1766_s16 = smov 0  }
   0xb   :  { %s1768_s17 = smov 0   ;;  %s1770_s18 = smov 0  }
   0xc   :  { %s1772_s19 = smov 0   ;;  %s1774_s20 = smov 0  }
   0xd LB: > { %s1795_s21 = sadd.s32 4294967295, %s1725_s20   ;;  %s1262_s22 = sadd.s32 4294967294, %s1725_s20   ;;  %s1725_s20 = sphi %s1774_s20, %s24_s20   ;;  %s1721_s19 = sphi %s1772_s19, %s2321_s19   ;;  %s1717_s18 = sphi %s1770_s18, %s2320_s18   ;;  %s1713_s17 = sphi %s1768_s17, %s2319_s17   ;;  %s1709_s16 = sphi %s1766_s16, %s2318_s16   ;;  %s1705_s15 = sphi %s1764_s15, %s2317_s15  }
   0xe   : > { %p56_p0 = scmp.ne.s32.totalorder %s1709_s16, %s1705_s15  ;;  %p57_p1 = scmp.eq.s32.totalorder %s1795_s21, 0 }
   0xf   : > { %p150_p2 = scmp.eq.s32.totalorder %s1795_s21, 1  ;;  %p156_p3 = scmp.eq.s32.totalorder %s1262_s22, 1 }
  0x10   : > { %p1804_p4 = por %p57_p1, %p56_p0  ;;  %p1263_p5 = scmp.ge.s32.totalorder %s1725_s20, 1 }
  0x11   : > { %p1809_p6 = por %p156_p3, %p56_p0  ;;  %p163_p7 = scmp.lt.s32.totalorder %s1725_s20, 3 }
  0x12   : > { %s1727_s26 = smov [#allocation10]   ;;  %s1728_s29 = smov [#allocation11]  }
  0x13   : > { %p1814_p8 = pnand %p1263_p5, %p163_p7  ;;  %s175_s27 = sshll.u32 %s1727_s26, 4  ;;  %s176_s27 = int_to_ptr.vmem [resolvable:$true] %s175_s27 }
  0x14   : > { %s188_s30 = sshll.u32 %s1728_s29, 4  ;;  %s1536_s5 = scalar_lea.vmem %s176_s27, 2048  ;;  %s189_s30 = int_to_ptr.vmem [resolvable:$true] %s188_s30 }
  0x15   : > { %p1403_p9 = pneg %p1814_p8  ;;  %p1537_p13 = scmp.ne.s32.totalorder %s176_s27, %s1536_s5 }
  0x16   : > { %p1544_p5 = scmp.lt.s32.totalorder %s176_s27, %s176_s27  ;;  %p1545_p7 = scmp.lt.s32.totalorder %s1536_s5, %s1536_s5 }
  0x17   : > { %p1823_p11 = pnand %p1403_p9, %p57_p1 }
  0x18   : > { %p1546_p10 = por %p1545_p7, %p1544_p5 }
  0x19   : > { %p1527_p12 = pneg %p1823_p11 }
  0x1b   : > { %p1539_p0 = pnand %p1537_p13, %p1527_p12 }
  0x1d   : > { %p1540_p3 = pneg %p1539_p0 }
  0x1f   : > { %p1547_p9 = pnand %p1546_p10, %p1540_p3 }
  0x21   : > { %1550 = shalt.err (!%p1547_p9)
}
  0x22   : > { %s2300_s6 = smov 128   ;;  %s2301_s7 = smov 8  }
  0x23   : > { %s2309_s2 = sld [smem:[#allocation20_spill]]  ;;  %s1562_s10 = scalar_lea.vmem %s189_s30, 2048 }
  0x24   : > { %p1563_p13 = scmp.ne.s32.totalorder %s189_s30, %s1562_s10  ;;  %p1570_p10 = scmp.lt.s32.totalorder %s189_s30, %s189_s30 }
  0x25   : > { %p1571_p3 = scmp.lt.s32.totalorder %s1562_s10, %s1562_s10 }
  0x26   : > { %p1565_p0 = pnand %p1563_p13, %p1527_p12 }
  0x27   : > { %p1572_p7 = por %p1571_p3, %p1570_p10 }
  0x28   : > { %p1566_p5 = pneg %p1565_p0 }
  0x29   : > { %1406 = dma.hbm_to_vmem [thread:$0]  (!%p1823_p11), %s2309_s2, 2048, %s176_s27, [#allocation9], %s2300_s6, %s2300_s6, %s2301_s7  }
  0x2a   : > { %p1573_p9 = pnand %p1572_p7, %p1566_p5 }
  0x2c   : > { %1576 = shalt.err (!%p1573_p9)
}
  0x2d   : > { %s2310_s3 = sld [smem:[#allocation21_spill]]  ;;  %s36_s13 = sadd.s32 1, %s1721_s19 }
  0x2e   : > { %s43_s14 = sadd.s32 1, %s1713_s17  ;;  %p38_p12 = scmp.ge.s32.totalorder %s36_s13, 2 }
  0x2f   : > { %p50_p13 = scmp.ne.s32.totalorder %s1713_s17, %s1709_s16  ;;  %p51_p0 = scmp.eq.s32.totalorder %s1725_s20, 0 }
  0x30   : > { %p1423_p5 = scmp.lt.s32.totalorder %s1725_s20, 2  ;;  %s2323_s13 = smov (%p38_p12, %s36_s13), 0 }
  0x31   : > { %p52_p10 = por %p51_p0, %p50_p13  ;;  %p1861_p3 = por %p150_p2, %p50_p13 }
  0x32   : > { %s40_s26 = ssub.s32 %s1721_s19, %s2323_s13  ;;  %s202_s27 = sand.u32 1, %s1713_s17  }
  0x33   : > { %1409 = dma.hbm_to_vmem [thread:$0]  (!%p1823_p11), %s2310_s3, 2048, %s189_s30, [#allocation12], %s2300_s6, %s2300_s6, %s2301_s7  }
  0x34   : > { %p41_p7 = scmp.eq.s32.totalorder %s40_s26, 0  ;;  %s1267_s28 = sshll.u32 %s202_s27, 3 }
  0x35   : > { %s1268_s29 = sshll.u32 %s1721_s19, 7  ;;  %s2312_s0 = sld [smem:[#allocation19_spill]] }
  0x36   : > { %s1870_s30 = scalar_select %p41_p7, %s1713_s17, %s43_s14  }
  0x37   : > { %s206_s10 = scalar_lea.vmem [#allocation5], %s1267_s28  ;;  %p1877_p11 = pnand %p1423_p5, %p52_p10 }
  0x38   : > { %s213_s11 = sshll.u32 %s206_s10, 4  ;;  %s1269_s6 = sshll.u32 %s202_s27, 7  ;;  %s214_s11 = int_to_ptr.vmem [resolvable:$true] %s213_s11 }
  0x39   : > { %s203_s26 = scalar_lea.sflag [#allocation6], %s202_s27  ;;  %p1579_p2 = pneg %p1877_p11 }
  0x3a   : > { %s1590_s14 = scalar_lea.vmem %s214_s11, 128  ;;  %s1731_s28 = smov [#allocation5]  }
  0x3b   : > { %s211_s9 = scalar_lea.hbm %s2312_s0, %s1268_s29  ;;  %p1591_p9 = scmp.ne.s32.totalorder %s214_s11, %s1590_s14 }
  0x3c   : > { %s1595_s29 = sshll.u32 %s1731_s28, 4  ;;  %s1596_s29 = int_to_ptr.vmem [resolvable:$false] %s1595_s29 }
  0x3d   : > { %p1593_p12 = pnand %p1591_p9, %p1579_p2  ;;  %s1597_s5 = scalar_lea.vmem %s1596_s29, 256 }
  0x3e   : > { %p1598_p0 = scmp.lt.s32.totalorder %s214_s11, %s1596_s29  ;;  %p1599_p5 = scmp.lt.s32.totalorder %s1597_s5, %s1590_s14 }
  0x3f   : > { %p1594_p13 = pneg %p1593_p12 }
  0x40   : > { %p1600_p10 = por %p1599_p5, %p1598_p0 }
  0x42   : > { %p1601_p7 = pnand %p1600_p10, %p1594_p13 }
  0x44   : > { %1604 = shalt.err (!%p1601_p7)
}
  0x45   : > { %1413 = dma.hbm_to_vmem [thread:$0]  (!%p1877_p11), %s211_s9, 128, %s214_s11, %s203_s26  }
  0x46   : > { %s1284_s27 = sshll.u32 %s1721_s19, 11  ;;  %s224_s8 = scalar_lea.vmem [#allocation8], %s1269_s6 }
  0x47   : > { %s234_s10 = sshll.u32 %s224_s8, 4  ;;  %s220_s7 = sand.u32 1, %s1725_s20   ;;  %s235_s10 = int_to_ptr.vmem [resolvable:$true] %s234_s10 }
  0x48   : > { %s233_s2 = scalar_lea.hbm %s2296_s1, %s1284_s27  ;;  %s221_s29 = scalar_lea.sflag [#allocation9], %s220_s7 }
  0x49   : > { %s1618_s14 = scalar_lea.vmem %s235_s10, 2048  ;;  %s1732_s5 = smov [#allocation8]  }
  0x4a   : > { %p1619_p9 = scmp.ne.s32.totalorder %s235_s10, %s1618_s14  ;;  %s1623_s3 = sshll.u32 %s1732_s5, 4  ;;  %s1624_s3 = int_to_ptr.vmem [resolvable:$false] %s1623_s3 }
  0x4b   : > { %s1625_s9 = scalar_lea.vmem %s1624_s3, 4096  ;;  %p1626_p0 = scmp.lt.s32.totalorder %s235_s10, %s1624_s3 }
  0x4c   : > { %p1621_p12 = pnand %p1619_p9, %p1579_p2  ;;  %p1627_p5 = scmp.lt.s32.totalorder %s1625_s9, %s1618_s14 }
  0x4e   : > { %p1622_p13 = pneg %p1621_p12  ;;  %p1628_p10 = por %p1627_p5, %p1626_p0 }
  0x50   : > { %p1629_p7 = pnand %p1628_p10, %p1622_p13 }
  0x52   : > { %1632 = shalt.err (!%p1629_p7)
}
  0x53   : > { %s2314_s0 = smov 8   ;;  %s2315_s6 = smov 128  }
  0x54   : > { %1416 = dma.hbm_to_vmem [thread:$0]  (!%p1877_p11), %s233_s2, 2048, %s235_s10, %s221_s29, %s2315_s6, %s2315_s6, %s2314_s0  }
  0x55   : > { %246 = sbr.rel (%p1814_p8) target bundleno = 1250 (0x4e2), region = 36  ;;  %s1904_s7 = sand.u32 (!%p1814_p8), 1, %s1709_s16  }
  0x56   : > { %s1274_s3 = sshll.u32 (!%p1814_p8), %s1904_s7, 3  ;;  %s249_s11 = scalar_lea.sflag (!%p1814_p8), [#allocation6], %s1904_s7 }
  0x57   : > { %s252_s26 = scalar_lea.vmem (!%p1814_p8), [#allocation5], %s1274_s3 }
  0x5a   : > { %1684 = dma.done.wait (%p1804_p4), %s249_s11, 128  }
  0x5b   : > { %1686 = vsyncadd (%p1804_p4), %s249_s11, 4294967168  ;;  %s257_s2 = sand.u32 1, %s1795_s21   ;;  %s1275_s25 = sshll.u32 %s1904_s7, 7 }
  0x5c   : > { %s258_s12 = scalar_lea.sflag [#allocation9], %s257_s2  ;;  %s1916_s27 = scalar_lea.vmem [#allocation8], %s1275_s25 }
  0x5d   : > { %1688 = dma.done.wait (%p1804_p4), %s258_s12, 2048  }
  0x5e   : > { %1690 = vsyncadd (%p1804_p4), %s258_s12, 4294965248 }
  0x5f   : > { %1692 = dma.done.wait (%p57_p1), [#allocation9], 2048  }
  0x60   : > { %1694 = vsyncadd (%p57_p1), [#allocation9], 4294965248 }
  0x61   : > { %1696 = dma.done.wait (%p57_p1), [#allocation12], 2048  }
  0x62   : > { %1698 = vsyncadd (%p57_p1), [#allocation12], 4294965248  ;;  %v331_v0 = vlaneseq  ;;  %v1733_v1 = vmov 1966171168   ;;  %v1934_v6 = vld [vmem:[%s252_s26] sm:$0xff]  ;;  %v1943_v12 = vld [vmem:[%s1916_s27] sm:$0xff] }
  0x63   : > { %v329_v2 = vunpack.c.l.s4 %v1733_v1  ;;  %v327_v9 = vcombine.high %v1934_v6, %v1934_v6  ;;  %v1947_v17 = vld [vmem:[%s1916_s27 + $0x10] sm:$0xff]  ;;  %v1950_v18 = vld [vmem:[%s1916_s27 + $0x8] sm:$0xff]  ;;  %v1955_v21 = vld [vmem:[%s1916_s27 + $0x18] sm:$0xff]  ;;  %vm305_vm0 = vcmask 7168   ;;  %v1734_v61 = vmov -1e+30  }
  0x64   : > { %v1931_v3 = vshrl.u32 %v331_v0, 7  ;;  %v1961_v26 = vld [vmem:[%s1916_s27 + $0x20] sm:$0xff]  ;;  %v1965_v28 = vld [vmem:[%s1916_s27 + $0x28] sm:$0xff]  ;;  %v1979_v39 = vld [vmem:[%s1916_s27 + $0x30] sm:$0xff]  ;;  %306 = vst.msk [vmem:[#allocation2] sm:$0xff] %vm305_vm0, %v1734_v61  ;;  %vm492_vm1 = vcmask 130112  }
  0x65   : > { %v330_v4 = vunpack.c.0.s8 %v329_v2  ;;  %v1970_v33 = vld [vmem:[%s1916_s27 + $0x40] sm:$0xff]  ;;  %v1974_v35 = vld [vmem:[%s1916_s27 + $0x48] sm:$0xff]  ;;  %v1983_v41 = vld [vmem:[%s1916_s27 + $0x38] sm:$0xff]  ;;  %vm557_vm2 = vcmask 1041409   ;;  %vm559_vm3 = vcmask 1042434   ;;  %vm561_vm4 = vcmask 1043459  }
  0x66   : > { %v1938_v8 = vsub.s32 0, %v1931_v3  ;;  %v1988_v45 = vld [vmem:[%s1916_s27 + $0x50] sm:$0xff]  ;;  %v1992_v47 = vld [vmem:[%s1916_s27 + $0x58] sm:$0xff]  ;;  %v1997_v51 = vld [vmem:[%s1916_s27 + $0x60] sm:$0xff]  ;;  %vm563_vm5 = vcmask 1044484   ;;  %vm565_vm6 = vcmask 1045509  }
  0x67   : > { %v333_v5 = vsub.s32 %v330_v4, %v1931_v3  ;;  %v2001_v53 = vld [vmem:[%s1916_s27 + $0x68] sm:$0xff]  ;;  %v2006_v56 = vld [vmem:[%s1916_s27 + $0x70] sm:$0xff]  ;;  %v2010_v58 = vld [vmem:[%s1916_s27 + $0x78] sm:$0xff]  ;;  %vm567_vm7 = vcmask 1046534   ;;  %vm569_vm8 = vcmask 1047559   ;;  %vm572_vm9 = vcmask 130048  }
  0x68   : > { %vm1737_vm10 = vmmov 0   ;;  %s1280_s21 = sshll.u32 %s1717_s18, 7  ;;  %s298_s23 = scalar_lea.vmem [#allocation13], %s1274_s3 }
  0x69   : > { %v334_v7 = vrot.slane %v1934_v6, %v333_v5  ;;  %v341_v16 = vrot.slane %v327_v9, %v333_v5  ;;  %s1138_s8 = sshll.u32 %s298_s23, 4  ;;  %s2253_s29 = scalar_lea.hbm %s2299_s4, %s1280_s21  ;;  %s1139_s8 = int_to_ptr.vmem [resolvable:$true] %s1138_s8 }
  0x6a   : > { %s1125_s14 = scalar_lea.sflag [#allocation7], %s1904_s7  ;;  %s1633_s5 = scalar_lea.vmem %s1139_s8, 128 }
  0x6b   : > { %v350_v10 = vrot.slane %v334_v7, %v333_v5  ;;  %v342_v11 = vcombine.high %v334_v7, %v334_v7  ;;  %v357_v25 = vrot.slane %v341_v16, %v333_v5  ;;  %v343_v32 = vcombine.high %v341_v16, %v341_v16  ;;  %p1634_p1 = scmp.ne.s32.totalorder %s1139_s8, %s1633_s5  ;;  %s1738_s9 = smov [#allocation13]  }
  0x6c   : > { %s1637_s0 = sshll.u32 %s1738_s9, 4  ;;  %s1638_s0 = int_to_ptr.vmem [resolvable:$false] %s1637_s0 }
  0x6d   : > { %v379_v13 = vrot.slane %v350_v10, %v1938_v8  ;;  %v364_v14 = vrot.slane %v342_v11, %v333_v5  ;;  %v372_v15 = vcombine.high %v350_v10, %v350_v10  ;;  %v395_v30 = vrot.slane %v357_v25, %v1938_v8  ;;  %p1635_p4 = pnand %p1634_p1, %p1861_p3  ;;  %s1639_s18 = scalar_lea.vmem %s1638_s0, 256 }
  0x6e   : > { %v371_v38 = vrot.slane %v343_v32, %v333_v5  ;;  %v373_v44 = vcombine.high %v357_v25, %v357_v25  ;;  %v482_v5 = vand.u32 127, %v331_v0  ;;  %p1640_p11 = scmp.lt.s32.totalorder %s1139_s8, %s1638_s0  ;;  %p1641_p2 = scmp.lt.s32.totalorder %s1639_s18, %s1633_s5 }
  0x6f   : > { %v416_v19 = vmul.f32 %v379_v13, %v1943_v12  ;;  %v383_v20 = vrot.slane %v364_v14, %v1938_v8  ;;  %v417_v23 = vmul.f32 %v379_v13, %v1950_v18  ;;  %v387_v24 = vrot.slane %v372_v15, %v1938_v8  ;;  %p1636_p8 = pneg %p1635_p4 }
  0x70   : > { %v374_v31 = vcombine.high %v364_v14, %v364_v14  ;;  %v424_v36 = vmul.f32 %v395_v30, %v1970_v33  ;;  %v425_v40 = vmul.f32 %v395_v30, %v1974_v35  ;;  %v399_v43 = vrot.slane %v371_v38, %v1938_v8  ;;  %p1642_p9 = por %p1641_p2, %p1640_p11 }
  0x71   : > { %432 = vadd.xlane.f32.xlu0 %v416_v19  ;;  %v418_v22 = vmul.f32 %v383_v20, %v1947_v17  ;;  %v419_v27 = vmul.f32 %v383_v20, %v1955_v21  ;;  %v420_v29 = vmul.f32 %v387_v24, %v1961_v26  ;;  %v421_v34 = vmul.f32 %v387_v24, %v1965_v28 }
  0x72   : > { %v391_v37 = vrot.slane %v374_v31, %v1938_v8  ;;  %v426_v48 = vmul.f32 %v399_v43, %v1988_v45  ;;  %v403_v49 = vrot.slane %v373_v44, %v1938_v8  ;;  %v375_v50 = vcombine.high %v371_v38, %v371_v38  ;;  %p1643_p12 = pnand %p1642_p9, %p1636_p8 }
  0x73   : > { %436 = vadd.xlane.f32.xlu1 %v418_v22  ;;  %v427_v52 = vmul.f32 %v399_v43, %v1992_v47  ;;  %v487_v10 = vadd.s32 4294967288, %v482_v5  ;;  %v2035_v14 = vsub.s32 %v482_v5, %v1931_v3 }
  0x74   : > { %v422_v42 = vmul.f32 %v391_v37, %v1979_v39  ;;  %v423_v46 = vmul.f32 %v391_v37, %v1983_v41  ;;  %v428_v54 = vmul.f32 %v403_v49, %v1997_v51  ;;  %v407_v55 = vrot.slane %v375_v50, %v1938_v8 }
  0x75   : > { %434 = vadd.xlane.f32.xlu0 %v417_v23  ;;  %v429_v57 = vmul.f32 %v403_v49, %v2001_v53  ;;  %v2038_v15 = vsub.s32 %v487_v10, %v1931_v3 }
  0x76   : > { %v430_v59 = vmul.f32 %v407_v55, %v2006_v56  ;;  %v431_v60 = vmul.f32 %v407_v55, %v2010_v58 }
  0x77   : > { %438 = vadd.xlane.f32.xlu1 %v419_v27 }
  0x79   : > { %440 = vadd.xlane.f32.xlu0 %v420_v29 }
  0x7b   : > { %442 = vadd.xlane.f32.xlu1 %v421_v34 }
  0x7d   : > { %448 = vadd.xlane.f32.xlu0 %v424_v36 }
  0x7f   : > { %450 = vadd.xlane.f32.xlu1 %v425_v40 }
  0x81   : > { %444 = vadd.xlane.f32.xlu0 %v422_v42 }
  0x83   : > { %446 = vadd.xlane.f32.xlu1 %v423_v46 }
  0x85   : > { %452 = vadd.xlane.f32.xlu0 %v426_v48 }
  0x87   : > { %454 = vadd.xlane.f32.xlu1 %v427_v52 }
  0x89   : > { %456 = vadd.xlane.f32.xlu0 %v428_v54 }
  0x8b   : > { %458 = vadd.xlane.f32.xlu1 %v429_v57 }
  0x8d   : > { %460 = vadd.xlane.f32.xlu0 %v430_v59 }
  0x8f   : > { %462 = vadd.xlane.f32.xlu1 %v431_v60 }
  0xfa   : > { %v2015_v62 = vpop.xlane.xlu0 %432 }
  0xfb   : > { %v486_v30 = vrot.slane %v2015_v62, %v2035_v14 }
  0xfc   : > { %v2017_v63 = vpop.xlane.xlu1 %436 }
  0xfd   : > { %v497_v23 = vrot.slane %v2017_v63, %v2035_v14 }
  0xfe   : > { %v2019_v1 = vpop.xlane.xlu0 %434 }
  0xff   : > { %v491_v24 = vrot.slane %v2019_v1, %v2038_v15 }
 0x100   : > { %v2021_v2 = vpop.xlane.xlu1 %438 }
 0x101   : > { %v501_v0 = vrot.slane %v2021_v2, %v2038_v15  ;;  %v493_v36 = vsel %vm492_vm1, %v491_v24, %v486_v30  ;;  %v2106_v30 = vld [vmem:[#allocation2] sm:$0xff] }
 0x102   : > { %v2023_v4 = vpop.xlane.xlu0 %440 }
 0x103   : > { %v506_v19 = vrot.slane %v2023_v4, %v2035_v14  ;;  %v502_v31 = vsel %vm492_vm1, %v501_v0, %v497_v23 }
 0x104   : > { %v2026_v7 = vpop.xlane.xlu1 %442  ;;  %v558_v42 = vsel %vm557_vm2, %v502_v31, %v493_v36 }
 0x105   : > { %v510_v20 = vrot.slane %v2026_v7, %v2038_v15 }
 0x106   : > { %v2028_v9 = vpop.xlane.xlu0 %448 }
 0x107   : > { %v511_v32 = vsel %vm492_vm1, %v510_v20, %v506_v19  ;;  %v524_v44 = vrot.slane %v2028_v9, %v2035_v14 }
 0x108   : > { %v2030_v11 = vpop.xlane.xlu1 %450  ;;  %v560_v49 = vsel %vm559_vm3, %v511_v32, %v558_v42  ;;  %v602_v42 = vsub.s32 4, %v1931_v3 }
 0x109   : > { %v528_v43 = vrot.slane %v2030_v11, %v2038_v15 }
 0x10a   : > { %v2032_v13 = vpop.xlane.xlu0 %444 }
 0x10b   : > { %v515_v27 = vrot.slane %v2032_v13, %v2035_v14  ;;  %v529_v59 = vsel %vm492_vm1, %v528_v43, %v524_v44 }
 0x10c   : > { %v2040_v16 = vpop.xlane.xlu1 %446 }
 0x10d   : > { %v519_v25 = vrot.slane %v2040_v16, %v2038_v15 }
 0x10e   : > { %v2048_v22 = vpop.xlane.xlu0 %452 }
 0x10f   : > { %v520_v37 = vsel %vm492_vm1, %v519_v25, %v515_v27  ;;  %v533_v40 = vrot.slane %v2048_v22, %v2035_v14  ;;  %v1735_v25 = vmov 0   ;;  %v1736_v27 = vmov 0.0  }
 0x110   : > { %v2058_v29 = vpop.xlane.xlu1 %454  ;;  %v562_v52 = vsel %vm561_vm4, %v520_v37, %v560_v49  ;;  %1484 = vset.pattern.permute.xlu1 %v1735_v25  ;;  %1485 = vset.pattern.permute.xlu0 %v1735_v25  ;;  %307 = vst.msk [vmem:[#allocation3] sm:$0xff] %vm305_vm0, %v1736_v27  ;;  %v590_v37 = vsub.s32 1, %v1931_v3  ;;  %v594_v49 = vsub.s32 2, %v1931_v3 }
 0x111   : > { %v537_v38 = vrot.slane %v2058_v29, %v2038_v15  ;;  %v564_v10 = vsel %vm563_vm5, %v529_v59, %v562_v52  ;;  %1354 = vmatprep.subr.mxu1 %v1736_v27  ;;  %1319 = vmatprep.subr.mxu0 %v1736_v27 }
 0x112   : > { %v2064_v34 = vpop.xlane.xlu0 %456  ;;  %1386 = vmatprep.mubr.msk.f32.mxu1 %vm1737_vm10, %v1736_v27  ;;  %1351 = vmatprep.mubr.msk.f32.mxu0 %vm1737_vm10, %v1736_v27 }
 0x113   : > { %v542_v48 = vrot.slane %v2064_v34, %v2035_v14  ;;  %v538_v55 = vsel %vm492_vm1, %v537_v38, %v533_v40 }
 0x114   : > { %v2077_v46 = vpop.xlane.xlu1 %458  ;;  %v566_v0 = vsel %vm565_vm6, %v538_v55, %v564_v10 }
 0x115   : > { %v546_v50 = vrot.slane %v2077_v46, %v2038_v15 }
 0x116   : > { %v2085_v54 = vpop.xlane.xlu0 %460 }
 0x117   : > { %v551_v57 = vrot.slane %v2085_v54, %v2035_v14  ;;  %v547_v61 = vsel %vm492_vm1, %v546_v50, %v542_v48  ;;  %v606_v50 = vsub.s32 5, %v1931_v3 }
 0x118   : > { %v2091_v60 = vpop.xlane.xlu1 %462  ;;  %v568_v20 = vsel %vm567_vm7, %v547_v61, %v566_v0  ;;  %v610_v61 = vsub.s32 6, %v1931_v3  ;;  %v598_v0 = vsub.s32 3, %v1931_v3 }
 0x119   : > { %v555_v5 = vrot.slane %v2091_v60, %v2038_v15 }
 0x11b   : > { %v556_v19 = vsel %vm492_vm1, %v555_v5, %v551_v57 }
 0x11c   : > { %v570_v23 = vsel %vm569_vm8, %v556_v19, %v568_v20  ;;  %v614_v19 = vsub.s32 7, %v1931_v3 }
 0x11d   : > { %v573_v24 = vsel %vm572_vm9, %v570_v23, -inf }
 0x11e   : > { %574 = vmax.xlane.f32.xlu0 %v573_v24 }
 0x1a7   : > { %v575_v31 = vpop.xlane.xlu0 %574 }
 0x1a8   : > { %v2109_v32 = vmax.f32 %v2106_v30, %v575_v31 }
 0x1aa   : > { %v577_v36 = vsub.f32 %v2106_v30, %v2109_v32  ;;  %937 = vst.msk [vmem:[#allocation2] sm:$0xff] %vm305_vm0, %v2109_v32  ;;  %582 = vperm.xlu1 %1484, %v2109_v32   ;;  %v971_v32 = vld [vmem:[#allocation11 + $0x28] sm:$0xff] }
 0x225   : > { %v583_v38 = vpop.permute.xlu1 %582 }
 0x226   : > { %v587_v40 = vrot.slane %v583_v38, %v1938_v8  ;;  %v591_v43 = vrot.slane %v583_v38, %v590_v37  ;;  %v603_v52 = vrot.slane %v583_v38, %v602_v42  ;;  %v595_v5 = vrot.slane %v583_v38, %v594_v49 }
 0x227   : > { %v607_v10 = vrot.slane %v583_v38, %v606_v50  ;;  %v611_v23 = vrot.slane %v583_v38, %v610_v61  ;;  %v599_v31 = vrot.slane %v583_v38, %v598_v0 }
 0x228   : > { %v624_v44 = vsub.f32 %v2015_v62, %v587_v40  ;;  %v625_v48 = vsub.f32 %v2019_v1, %v587_v40  ;;  %v626_v55 = vsub.f32 %v2017_v63, %v591_v43  ;;  %v627_v8 = vsub.f32 %v2021_v2, %v591_v43 }
 0x229   : > { %v633_v62 = vsub.f32 %v2030_v11, %v603_v52  ;;  %v628_v20 = vsub.f32 %v2023_v4, %v595_v5  ;;  %v635_v24 = vsub.f32 %v2058_v29, %v607_v10  ;;  %v629_v2 = vsub.f32 %v2026_v7, %v595_v5 }
 0x22a   : > { %v640_v57 = vmul.f32 1.442695, %v624_v44  ;;  %v642_v59 = vmul.f32 1.442695, %v625_v48  ;;  %v644_v1 = vmul.f32 1.442695, %v626_v55  ;;  %v615_v11 = vrot.slane %v583_v38, %v614_v19 }
 0x22b   : > { %v646_v63 = vmul.f32 1.442695, %v627_v8  ;;  %v658_v25 = vmul.f32 1.442695, %v633_v62  ;;  %v648_v37 = vmul.f32 1.442695, %v628_v20  ;;  %v637_v40 = vsub.f32 %v2077_v46, %v611_v23 }
 0x22c   : > { %1487 = vpow2.f32 %v640_v57  ;;  %v662_v42 = vmul.f32 1.442695, %v635_v24  ;;  %v630_v3 = vsub.f32 %v2032_v13, %v599_v31  ;;  %v650_v4 = vmul.f32 1.442695, %v629_v2 }
 0x22d   : > { %1489 = vpow2.f32 %v642_v59  ;;  %v639_v44 = vsub.f32 %v2091_v60, %v615_v11  ;;  %v666_v29 = vmul.f32 1.442695, %v637_v40  ;;  %v631_v38 = vsub.f32 %v2040_v16, %v599_v31 }
 0x22e   : > { %1491 = vpow2.f32 %v644_v1  ;;  %v652_v7 = vmul.f32 1.442695, %v630_v3  ;;  %v632_v50 = vsub.f32 %v2028_v9, %v603_v52  ;;  %v634_v59 = vsub.f32 %v2048_v22, %v607_v10 }
 0x22f   : > { %1493 = vpow2.f32 %v646_v63  ;;  %v670_v46 = vmul.f32 1.442695, %v639_v44  ;;  %v654_v55 = vmul.f32 1.442695, %v631_v38  ;;  %v636_v8 = vsub.f32 %v2064_v34, %v611_v23 }
 0x230   : > { %1495 = vpow2.f32 %v658_v25  ;;  %v656_v61 = vmul.f32 1.442695, %v632_v50  ;;  %v660_v62 = vmul.f32 1.442695, %v634_v59  ;;  %v638_v52 = vsub.f32 %v2085_v54, %v615_v11 }
 0x231   : > { %1497 = vpow2.f32 %v648_v37  ;;  %v664_v0 = vmul.f32 1.442695, %v636_v8 }
 0x232   : > { %1499 = vpow2.f32 %v662_v42  ;;  %v668_v22 = vmul.f32 1.442695, %v638_v52 }
 0x233   : > { %1501 = vpow2.f32 %v650_v4 }
 0x234   : > { %1503 = vpow2.f32 %v666_v29 }
 0x235   : > { %1505 = vpow2.f32 %v652_v7 }
 0x236   : > { %1507 = vpow2.f32 %v670_v46 }
 0x237   : > { %1509 = vpow2.f32 %v654_v55 }
 0x238   : > { %1511 = vpow2.f32 %v656_v61 }
 0x239   : > { %v1488_v43 = vpop.eup %1487  ;;  %1513 = vpow2.f32 %v660_v62 }
 0x23a   : > { %v1490_v48 = vpop.eup %1489  ;;  %691 = vperm.xlu0 %1485, %v1488_v43   ;;  %1515 = vpow2.f32 %v664_v0 }
 0x23b   : > { %694 = vperm.xlu1 %1484, %v1490_v48   ;;  %v1492_v49 = vpop.eup %1491  ;;  %1517 = vpow2.f32 %v668_v22 }
 0x23c   : > { %v1494_v13 = vpop.eup %1493 }
 0x23d   : > { %v1496_v60 = vpop.eup %1495 }
 0x23e   : > { %718 = vperm.xlu0 %1485, %v1496_v60   ;;  %v1498_v57 = vpop.eup %1497 }
 0x23f   : > { %697 = vperm.xlu1 %1484, %v1492_v49   ;;  %v1500_v5 = vpop.eup %1499 }
 0x240   : > { %v1502_v16 = vpop.eup %1501 }
 0x241   : > { %v1504_v1 = vpop.eup %1503 }
 0x242   : > { %724 = vperm.xlu0 %1485, %v1500_v5   ;;  %v1506_v9 = vpop.eup %1505 }
 0x243   : > { %700 = vperm.xlu1 %1484, %v1494_v13   ;;  %v1508_v19 = vpop.eup %1507 }
 0x244   : > { %v1510_v10 = vpop.eup %1509 }
 0x245   : > { %v1512_v20 = vpop.eup %1511 }
 0x246   : > { %730 = vperm.xlu0 %1485, %v1504_v1   ;;  %v1514_v34 = vpop.eup %1513 }
 0x247   : > { %703 = vperm.xlu1 %1484, %v1498_v57   ;;  %v1516_v63 = vpop.eup %1515 }
 0x248   : > { %v1518_v23 = vpop.eup %1517 }
 0x24a   : > { %736 = vperm.xlu0 %1485, %v1508_v19  }
 0x24b   : > { %706 = vperm.xlu1 %1484, %v1502_v16  }
 0x24f   : > { %709 = vperm.xlu1 %1484, %v1506_v9  }
 0x253   : > { %712 = vperm.xlu1 %1484, %v1510_v10  }
 0x257   : > { %715 = vperm.xlu1 %1484, %v1512_v20  }
 0x25b   : > { %721 = vperm.xlu1 %1484, %v1514_v34  }
 0x25f   : > { %727 = vperm.xlu1 %1484, %v1516_v63  }
 0x263   : > { %733 = vperm.xlu1 %1484, %v1518_v23  }
 0x2b5   : > { %v692_v24 = vpop.permute.xlu0 %691 }
 0x2b6   : > { %v695_v54 = vpop.permute.xlu1 %694  ;;  %v847_v25 = vmul.f32 %v692_v24, %v1943_v12  ;;  %v741_v52 = vrot.slane %v692_v24, %v2035_v14 }
 0x2b7   : > { %v848_v31 = vmul.f32 %v695_v54, %v1950_v18  ;;  %v745_v9 = vrot.slane %v695_v54, %v2038_v15 }
 0x2b9   : > { %v863_v2 = vadd.f32 %v848_v31, %v847_v25  ;;  %v2146_v13 = vpop.permute.xlu0 %718  ;;  %v746_v54 = vsel %vm492_vm1, %v745_v9, %v741_v52 }
 0x2ba   : > { %v698_v37 = vpop.permute.xlu1 %697  ;;  %v856_v20 = vmul.f32 %v2146_v13, %v1974_v35 }
 0x2bb   : > { %v864_v11 = vrot.slane %v863_v2, 4  ;;  %v849_v3 = vmul.f32 %v698_v37, %v1947_v17 }
 0x2bd   : > { %v865_v40 = vadd.f32 %v864_v11, %v863_v2  ;;  %v725_v8 = vpop.permute.xlu0 %724  ;;  %v781_v11 = vrot.slane %v2146_v13, %v2038_v15 }
 0x2be   : > { %v701_v42 = vpop.permute.xlu1 %700 }
 0x2bf   : > { %v850_v4 = vmul.f32 %v701_v42, %v1955_v21  ;;  %v866_v43 = vrot.slane %v865_v40, 2  ;;  %v754_v22 = vrot.slane %v701_v42, %v2038_v15 }
 0x2c1   : > { %v870_v44 = vadd.f32 %v850_v4, %v849_v3  ;;  %v867_v7 = vadd.f32 %v866_v43, %v865_v40  ;;  %v731_v25 = vpop.permute.xlu0 %730 }
 0x2c2   : > { %v704_v29 = vpop.permute.xlu1 %703  ;;  %v799_v13 = vrot.slane %v731_v25, %v2038_v15 }
 0x2c3   : > { %v871_v48 = vrot.slane %v870_v44, 4  ;;  %v851_v12 = vmul.f32 %v704_v29, %v1961_v26  ;;  %v868_v55 = vrot.slane %v867_v7, 1  ;;  %v759_v35 = vrot.slane %v704_v29, %v2035_v14 }
 0x2c5   : > { %v872_v38 = vadd.f32 %v871_v48, %v870_v44  ;;  %v869_v61 = vadd.f32 %v868_v55, %v867_v7  ;;  %v2176_v55 = vpop.permute.xlu0 %736 }
 0x2c6   : > { %v707_v46 = vpop.permute.xlu1 %706 }
 0x2c7   : > { %v852_v18 = vmul.f32 %v707_v46, %v1965_v28  ;;  %v873_v49 = vrot.slane %v872_v38, 2  ;;  %v763_v23 = vrot.slane %v707_v46, %v2038_v15 }
 0x2c9   : > { %v877_v50 = vadd.f32 %v852_v18, %v851_v12  ;;  %v874_v60 = vadd.f32 %v873_v49, %v872_v38  ;;  %v764_v44 = vsel %vm492_vm1, %v763_v23, %v759_v35 }
 0x2ca   : > { %v710_v17 = vpop.permute.xlu1 %709 }
 0x2cb   : > { %v878_v57 = vrot.slane %v877_v50, 4  ;;  %v875_v21 = vrot.slane %v874_v60, 1  ;;  %v853_v1 = vmul.f32 %v710_v17, %v1979_v39  ;;  %v768_v48 = vrot.slane %v710_v17, %v2035_v14 }
 0x2cd   : > { %v879_v59 = vadd.f32 %v878_v57, %v877_v50  ;;  %v876_v5 = vadd.f32 %v875_v21, %v874_v60 }
 0x2ce   : > { %v713_v16 = vpop.permute.xlu1 %712 }
 0x2cf   : > { %v880_v62 = vrot.slane %v879_v59, 2  ;;  %v854_v26 = vmul.f32 %v713_v16, %v1983_v41  ;;  %v927_v28 = vsel %vm557_vm2, %v876_v5, %v869_v61  ;;  %v750_v41 = vrot.slane %v698_v37, %v2035_v14 }
 0x2d0   : > { %v772_v42 = vrot.slane %v713_v16, %v2038_v15  ;;  %v858_v37 = vmul.f32 %v725_v8, %v1992_v47  ;;  %v790_v47 = vrot.slane %v725_v8, %v2038_v15 }
 0x2d1   : > { %v881_v0 = vadd.f32 %v880_v62, %v879_v59  ;;  %v884_v19 = vadd.f32 %v854_v26, %v853_v1  ;;  %v755_v40 = vsel %vm492_vm1, %v754_v22, %v750_v41  ;;  %v860_v59 = vmul.f32 %v731_v25, %v2001_v53 }
 0x2d2   : > { %v716_v10 = vpop.permute.xlu1 %715  ;;  %v810_v49 = vsel %vm557_vm2, %v755_v40, %v746_v54 }
 0x2d3   : > { %v882_v34 = vrot.slane %v881_v0, 1  ;;  %v885_v63 = vrot.slane %v884_v19, 4  ;;  %v855_v39 = vmul.f32 %v716_v10, %v1970_v33  ;;  %v777_v7 = vrot.slane %v716_v10, %v2035_v14 }
 0x2d4   : > { %v811_v61 = vsel %vm559_vm3, %v764_v44, %v810_v49  ;;  %v980_v44 = vld [vmem:[#allocation11 + $0x70] sm:$0xff] }
 0x2d5   : > { %v883_v24 = vadd.f32 %v882_v34, %v881_v0  ;;  %v886_v31 = vadd.f32 %v885_v63, %v884_v19  ;;  %v891_v2 = vadd.f32 %v856_v20, %v855_v39  ;;  %v782_v5 = vsel %vm492_vm1, %v781_v11, %v777_v7  ;;  %v979_v7 = vld [vmem:[#allocation11 + $0x68] sm:$0xff]  ;;  %v976_v49 = vld [vmem:[#allocation11 + $0x50] sm:$0xff] }
 0x2d6   : > { %v722_v33 = vpop.permute.xlu1 %721 }
 0x2d7   : > { %v887_v3 = vrot.slane %v886_v31, 2  ;;  %v892_v4 = vrot.slane %v891_v2, 4  ;;  %v857_v43 = vmul.f32 %v722_v33, %v1988_v45  ;;  %v928_v38 = vsel %vm559_vm3, %v883_v24, %v927_v28 }
 0x2d8   : > { %v786_v29 = vrot.slane %v722_v33, %v2035_v14  ;;  %v773_v45 = vsel %vm492_vm1, %v772_v42, %v768_v48  ;;  %v808_v28 = vrot.slane %v2176_v55, %v2038_v15  ;;  %v963_v48 = vld [vmem:[#allocation10 + $0x68] sm:$0xff] }
 0x2d9   : > { %v888_v46 = vadd.f32 %v887_v3, %v886_v31  ;;  %v893_v12 = vadd.f32 %v892_v4, %v891_v2  ;;  %v898_v18 = vadd.f32 %v858_v37, %v857_v43  ;;  %v812_v9 = vsel %vm561_vm4, %v773_v45, %v811_v61  ;;  %v965_v3 = vld [vmem:[#allocation10 + $0x78] sm:$0xff]  ;;  %v964_v43 = vld [vmem:[#allocation10 + $0x70] sm:$0xff]  ;;  %v958_v45 = vld [vmem:[#allocation10 + $0x40] sm:$0xff] }
 0x2da   : > { %v728_v50 = vpop.permute.xlu1 %727  ;;  %v791_v1 = vsel %vm492_vm1, %v790_v47, %v786_v29  ;;  %v813_v10 = vsel %vm563_vm5, %v782_v5, %v812_v9  ;;  %v981_v4 = vld [vmem:[#allocation11 + $0x78] sm:$0xff]  ;;  %1355 = vmatpush3.msra.mxu1 %v965_v3  ;;  %v959_v47 = vld [vmem:[#allocation10 + $0x48] sm:$0xff] }
 0x2db   : > { %v889_v60 = vrot.slane %v888_v46, 1  ;;  %v894_v17 = vrot.slane %v893_v12, 2  ;;  %v899_v57 = vrot.slane %v898_v18, 4  ;;  %v795_v21 = vrot.slane %v728_v50, %v2035_v14  ;;  %1320 = vmatpush3.msra.mxu0 %v981_v4  ;;  %1356 = vmatprep.subr.mxu1 %v1736_v27  ;;  %v977_v29 = vld [vmem:[#allocation11 + $0x58] sm:$0xff] }
 0x2dc   : > { %v859_v16 = vmul.f32 %v728_v50, %v1997_v51  ;;  %v814_v34 = vsel %vm565_vm6, %v791_v1, %v813_v10  ;;  %1321 = vmatprep.subr.mxu0 %v1736_v27  ;;  %1357 = vmatpush3.msra.mxu1 %v964_v43  ;;  %v974_v50 = vld [vmem:[#allocation11 + $0x40] sm:$0xff]  ;;  %v955_v1 = vld [vmem:[#allocation10 + $0x28] sm:$0xff]  ;;  %v969_v9 = vld [vmem:[#allocation11 + $0x18] sm:$0xff] }
 0x2dd   : > { %v890_v8 = vadd.f32 %v889_v60, %v888_v46  ;;  %v895_v62 = vadd.f32 %v894_v17, %v893_v12  ;;  %v900_v26 = vadd.f32 %v899_v57, %v898_v18  ;;  %v800_v53 = vsel %vm492_vm1, %v799_v13, %v795_v21  ;;  %1322 = vmatpush3.msra.mxu0 %v980_v44  ;;  %v978_v46 = vld [vmem:[#allocation11 + $0x60] sm:$0xff]  ;;  %v961_v12 = vld [vmem:[#allocation10 + $0x58] sm:$0xff]  ;;  %v960_v18 = vld [vmem:[#allocation10 + $0x50] sm:$0xff] }
 0x2de   : > { %v905_v52 = vadd.f32 %v860_v59, %v859_v16  ;;  %v2187_v0 = vpop.permute.xlu1 %733  ;;  %v815_v23 = vsel %vm567_vm7, %v800_v53, %v814_v34  ;;  %1358 = vmatprep.subr.mxu1 %v1736_v27  ;;  %1323 = vmatprep.subr.mxu0 %v1736_v27  ;;  %v975_v13 = vld [vmem:[#allocation11 + $0x48] sm:$0xff]  ;;  %v957_v60 = vld [vmem:[#allocation10 + $0x38] sm:$0xff]  ;;  %v578_v17 = vmul.f32 1.442695, %v577_v36  ;;  %v954_v36 = vld [vmem:[#allocation10 + $0x20] sm:$0xff]  ;;  %v862_v34 = vmul.f32 %v2176_v55, %v2010_v58 }
 0x2df   : > { %v896_v19 = vrot.slane %v895_v62, 1  ;;  %v901_v22 = vrot.slane %v900_v26, 2  ;;  %v804_v51 = vrot.slane %v2187_v0, %v2035_v14  ;;  %v929_v63 = vsel %vm561_vm4, %v890_v8, %v928_v38  ;;  %v962_v38 = vld [vmem:[#allocation10 + $0x60] sm:$0xff]  ;;  %1359 = vmatpush3.msra.mxu1 %v963_v48  ;;  %1324 = vmatpush3.msra.mxu0 %v979_v7  ;;  %v672_v21 = vld [vmem:[#allocation3] sm:$0xff]  ;;  %v973_v16 = vld [vmem:[#allocation11 + $0x38] sm:$0xff] }
 0x2e0   : > { %v906_v20 = vrot.slane %v905_v52, 4  ;;  %1360 = vmatprep.subr.mxu1 %v1736_v27  ;;  %1325 = vmatprep.subr.mxu0 %v1736_v27  ;;  %1519 = vpow2.f32 %v578_v17  ;;  %v956_v8 = vld [vmem:[#allocation10 + $0x30] sm:$0xff]  ;;  %v966_v10 = vld [vmem:[#allocation11] sm:$0xff] }
 0x2e1   : > { %v897_v15 = vadd.f32 %v896_v19, %v895_v62  ;;  %v902_v39 = vadd.f32 %v901_v22, %v900_v26  ;;  %v809_v41 = vsel %vm492_vm1, %v808_v28, %v804_v51  ;;  %1361 = vmatpush3.msra.mxu1 %v962_v38  ;;  %1326 = vmatpush3.msra.mxu0 %v978_v46  ;;  %v972_v62 = vld [vmem:[#allocation11 + $0x30] sm:$0xff]  ;;  %v970_v26 = vld [vmem:[#allocation11 + $0x20] sm:$0xff]  ;;  %v953_v28 = vld [vmem:[#allocation10 + $0x18] sm:$0xff] }
 0x2e2   : > { %v907_v54 = vadd.f32 %v906_v20, %v905_v52  ;;  %v816_v25 = vsel %vm569_vm8, %v809_v41, %v815_v23  ;;  %1362 = vmatprep.subr.mxu1 %v1736_v27  ;;  %1327 = vmatprep.subr.mxu0 %v1736_v27  ;;  %v952_v52 = vld [vmem:[#allocation10 + $0x10] sm:$0xff]  ;;  %v951_v19 = vld [vmem:[#allocation10 + $0x8] sm:$0xff]  ;;  %v950_v51 = vld [vmem:[#allocation10] sm:$0xff]  ;;  %v861_v20 = vmul.f32 %v2187_v0, %v2006_v56 }
 0x2e3   : > { %v903_v24 = vrot.slane %v902_v39, 1  ;;  %v818_v31 = vsel %vm572_vm9, %v816_v25, 0.0  ;;  %v930_v14 = vsel %vm563_vm5, %v897_v15, %v929_v63  ;;  %1363 = vmatpush3.msra.mxu1 %v961_v12  ;;  %1328 = vmatpush3.msra.mxu0 %v977_v29  ;;  %v968_v53 = vld [vmem:[#allocation11 + $0x10] sm:$0xff]  ;;  %v967_v22 = vld [vmem:[#allocation11 + $0x8] sm:$0xff] }
 0x2e4   : > { %v908_v2 = vrot.slane %v907_v54, 2  ;;  %819 = vadd.xlane.f32.xlu1 %v818_v31  ;;  %1364 = vmatprep.subr.mxu1 %v1736_v27  ;;  %v912_v63 = vadd.f32 %v862_v34, %v861_v20 }
 0x2e5   : > { %v904_v11 = vadd.f32 %v903_v24, %v902_v39  ;;  %1329 = vmatprep.subr.mxu0 %v1736_v27  ;;  %1365 = vmatpush3.msra.mxu1 %v960_v18 }
 0x2e6   : > { %v909_v40 = vadd.f32 %v908_v2, %v907_v54  ;;  %1330 = vmatpush3.msra.mxu0 %v976_v49  ;;  %1366 = vmatprep.subr.mxu1 %v1736_v27  ;;  %v913_v15 = vrot.slane %v912_v63, 4 }
 0x2e7   : > { %v931_v35 = vsel %vm565_vm6, %v904_v11, %v930_v14  ;;  %1331 = vmatprep.subr.mxu0 %v1736_v27  ;;  %1367 = vmatpush3.msra.mxu1 %v959_v47 }
 0x2e8   : > { %v910_v42 = vrot.slane %v909_v40, 1  ;;  %1332 = vmatpush3.msra.mxu0 %v975_v13  ;;  %1368 = vmatprep.subr.mxu1 %v1736_v27  ;;  %v914_v39 = vadd.f32 %v913_v15, %v912_v63 }
 0x2e9   : > { %1333 = vmatprep.subr.mxu0 %v1736_v27  ;;  %1369 = vmatpush3.msra.mxu1 %v958_v45 }
 0x2ea   : > { %v911_v33 = vadd.f32 %v910_v42, %v909_v40  ;;  %1334 = vmatpush3.msra.mxu0 %v974_v50  ;;  %1370 = vmatprep.subr.mxu1 %v1736_v27  ;;  %v915_v41 = vrot.slane %v914_v39, 2 }
 0x2eb   : > { %1335 = vmatprep.subr.mxu0 %v1736_v27  ;;  %1371 = vmatpush3.msra.mxu1 %v957_v60 }
 0x2ec   : > { %v2202_v37 = vsel %vm567_vm7, %v911_v33, %v931_v35  ;;  %1372 = vmatprep.subr.mxu1 %v1736_v27  ;;  %1336 = vmatpush3.msra.mxu0 %v973_v16  ;;  %v916_v23 = vadd.f32 %v915_v41, %v914_v39 }
 0x2ed   : > { %v1520_v57 = vpop.eup %1519  ;;  %1373 = vmatpush3.msra.mxu1 %v956_v8  ;;  %1337 = vmatprep.subr.mxu0 %v1736_v27 }
 0x2ee   : > { %v673_v59 = vmul.f32 %v1520_v57, %v672_v21  ;;  %1374 = vmatprep.subr.mxu1 %v1736_v27  ;;  %1338 = vmatpush3.msra.mxu0 %v972_v62  ;;  %v917_v25 = vrot.slane %v916_v23, 1 }
 0x2ef   : > { %1375 = vmatpush3.msra.mxu1 %v955_v1  ;;  %1339 = vmatprep.subr.mxu0 %v1736_v27 }
 0x2f0   : > { %1376 = vmatprep.subr.mxu1 %v1736_v27  ;;  %1340 = vmatpush3.msra.mxu0 %v971_v32  ;;  %v918_v24 = vadd.f32 %v917_v25, %v916_v23 }
 0x2f1   : > { %1377 = vmatpush3.msra.mxu1 %v954_v36  ;;  %1341 = vmatprep.subr.mxu0 %v1736_v27 }
 0x2f2   : > { %1378 = vmatprep.subr.mxu1 %v1736_v27  ;;  %1342 = vmatpush3.msra.mxu0 %v970_v26 }
 0x2f3   : > { %1379 = vmatpush3.msra.mxu1 %v953_v28  ;;  %1343 = vmatprep.subr.mxu0 %v1736_v27 }
 0x2f4   : > { %1380 = vmatprep.subr.mxu1 %v1736_v27  ;;  %1344 = vmatpush3.msra.mxu0 %v969_v9 }
 0x2f5   : > { %1381 = vmatpush3.msra.mxu1 %v952_v52  ;;  %1345 = vmatprep.subr.mxu0 %v1736_v27 }
 0x2f6   : > { %1382 = vmatprep.subr.mxu1 %v1736_v27  ;;  %1346 = vmatpush3.msra.mxu0 %v968_v53 }
 0x2f7   : > { %1383 = vmatpush3.msra.mxu1 %v951_v19  ;;  %1347 = vmatprep.subr.mxu0 %v1736_v27 }
 0x2f8   : > { %1384 = vmatprep.subr.mxu1 %v1736_v27  ;;  %1348 = vmatpush3.msra.mxu0 %v967_v22 }
 0x2f9   : > { %1385 = vmatpush3.msra.mxu1 %v950_v51  ;;  %1349 = vmatprep.subr.mxu0 %v1736_v27  ;;  %v933_v27 = vsel %vm569_vm8, %v918_v24, %v2202_v37 }
 0x2fa   : > { %1387 = vmatmul.mubr.f32.vlgmr.msra.gmra.mxu1 %v1934_v6  ;;  %1350 = vmatpush3.msra.mxu0 %v966_v10 }
 0x36d   : > { %v820_v61 = vpop.xlane.xlu1 %819 }
 0x36e   : > { %v821_v5 = vadd.f32 %v820_v61, %v673_v59 }
 0x370   : > { %823 = vst.msk [vmem:[#allocation3] sm:$0xff] %vm305_vm0, %v821_v5 }
 0x377   : > { %v942_v30 = vld [vmem:[#allocation3] sm:$0xff] }
 0x378   : > { %945 = vperm.xlu0 %1485, %v942_v30  }
 0x37c   : > { %827 = vperm.xlu0 %1485, %v1520_v57  }
 0x3ba   : > { %v1118_v55 = vpop.f32.mrf.mxu1 }
 0x3bc   : > { %v1388_v14 = vpop.f32.mrf.mxu1 }
 0x3f3   : > { %v946_v54 = vpop.permute.xlu0 %945 }
 0x3f4   : > { %1521 = vrcp.f32 %v946_v54 }
 0x3f7   : > { %v828_v6 = vpop.permute.xlu0 %827 }
 0x3f8   : > { %v830_v31 = vmul.f32 0.0, %v828_v6 }
 0x3fa   : > { %v935_v56 = vadd.f32 %v933_v27, %v830_v31 }
 0x401   : > { %v1522_v0 = vpop.eup %1521 }
 0x402   : > { %v949_v58 = vmul.f32 %v1522_v0, %v935_v56 }
 0x404   : > { %1352 = vmatmul.mubr.f32.vlgmr.msra.gmra.mxu0 %v949_v58 }
 0x4c4   : > { %v1048_v2 = vpop.f32.mrf.mxu0 }
 0x4c5   : > { %v1119_v11 = vadd.f32 %v1118_v55, %v1048_v2 }
 0x4c6   : > { %v1353_v40 = vpop.f32.mrf.mxu0 }
 0x4c7   : > { %1523 = vtanh.f32 %v1119_v11 }
 0x4d4   : > { %v1524_v35 = vpop.eup %1523 }
 0x4d5   : > { %1123 = vst [vmem:[%s298_s23] sm:$0xff] %v1524_v35 }
 0x4d6   : > { %1646 = shalt.err (!%p1643_p12)
}
 0x4d7   : > { %s1647_s6 = scalar_lea.hbm %s2253_s29, 128  ;;  %s1651_s11 = scalar_lea.hbm %s2299_s4, 256 }
 0x4d8   : > { %p1648_p13 = scmp.ne.s32.totalorder %s2253_s29, %s1647_s6  ;;  %p1652_p10 = scmp.lt.s32.totalorder %s2253_s29, %s2299_s4 }
 0x4d9   : > { %p1653_p7 = scmp.lt.s32.totalorder %s1651_s11, %s1647_s6 }
 0x4da   : > { %p1649_p0 = pnand %p1648_p13, %p1861_p3 }
 0x4db   : > { %p1654_p1 = por %p1653_p7, %p1652_p10 }
 0x4dc   : > { %p1650_p5 = pneg %p1649_p0 }
 0x4de   : > { %p1655_p4 = pnand %p1654_p1, %p1650_p5 }
 0x4e0   : > { %1658 = shalt.err (!%p1655_p4)
}
 0x4e1   : > { %1401 = dma.vmem_to_hbm [thread:$0]  (%p1861_p3), %s1139_s8, 128, %s2253_s29, %s1125_s14  }
 0x4e2 PF: > { %s1150_s25 = sand.u32 1, %s1705_s15   ;;  %p2316_p8 = scmp.ge.s32.totalorder %s1725_s20, 2 }
 0x4e3   : > { %s1151_s12 = scalar_lea.sflag [#allocation7], %s1150_s25 }
 0x4e4   : > { %p1418_p11 = pnand %p2316_p8, %p1809_p6 }
 0x4e6   : > { %p1419_p2 = pneg %p1418_p11 }
 0x4e8   : > { %1700 = dma.done.wait (%p1419_p2), %s1151_s12, 128  }
 0x4e9   : > { %1702 = vsyncadd (%p1419_p2), %s1151_s12, 4294967168  ;;  %s24_s20 = sadd.s32 1, %s1725_s20   ;;  %s2317_s15 = smov %s1709_s16 }
 0x4ea   : > { %p21_p9 = scmp.ge.s32.totalorder %s24_s20, 4   ;;  %s2318_s16 = smov %s1713_s17 }
 0x4eb   : > { %s2319_s17 = smov %s1870_s30  ;;  %s2320_s18 = smov %s1721_s19 }
 0x4ec   : > { %s2321_s19 = smov %s2323_s13  ;;  %23 = sbr.rel (!%p21_p9) target bundleno = 13 (0xd), region = 110 }
 0x4f1   :  { %1156 = vsyncpa [#allocation6], 1 }
 0x4f2   :  { %1158 = vsyncpa [#allocation6 + $0x1], 1 }
 0x4f3   :  { %1159 = vsyncpa [#allocation9], 1 }
 0x4f4   :  { %1161 = vsyncpa [#allocation9 + $0x1], 1 }
 0x4f5   :  { %1162 = vsyncpa [#allocation12], 1 }
 0x4f6   :  { %1163 = vsyncpa [#allocation7], 1 }
 0x4f7   :  { %1165 = vsyncpa [#allocation7 + $0x1], 1 }

</bundles_post_ra>
